<compile_context>
chip_gen: v7x
topology: tpu7x:2x2x1
jax: 0.10.0
libtpu: 0.0.40
codegen_flags: <defaults>
</compile_context>

<pallas_src>
import jax
import jax.numpy as jnp
from jax.experimental import pallas as pl
from jax.experimental.pallas import tpu as pltpu


def _voting_kernel(inv_voter: float):
    def kernel(x_ref, p_ref, o_ref):
        # (TN, C) @ (C, num_classes) on the MXU, f32 accumulation.
        acc = jnp.dot(x_ref[...], p_ref[...],
                      preferred_element_type=jnp.float32)
        o_ref[...] = (acc * inv_voter).astype(o_ref.dtype)
    return kernel


def _choose_tile_rows(n: int, c: int, itemsize: int) -> int:
    """Pick a batch-tile size: big enough to stream, small enough for VMEM.

    Keeps the double-buffered (TN, C) input block <= ~4 MiB so the kernel is
    safe on v5e's 16 MiB scoped default and v7x's 64 MiB physical VMEM.
    """
    budget_bytes = 4 * 1024 * 1024
    max_rows = max(8, budget_bytes // (2 * c * itemsize))
    tn = min(n, 512, max_rows)
    if tn < n:
        # Tile smaller than the array: must be a multiple of 8 (sublane rule).
        tn = max(8, (tn // 8) * 8)
    return tn


def voting_layer(x: jnp.ndarray, voter_num: int) -> jnp.ndarray:
    """x: (N, C) with C divisible by voter_num. Returns (N, C // voter_num)."""
    n, c = x.shape
    assert c % voter_num == 0, "C must be divisible by voter_num"
    num_classes = c // voter_num

    # Static 0/1 pooling-selection matrix (C, num_classes); exact in any float
    # dtype, so the 1/voter_num scale is applied in f32 inside the kernel.
    col = jnp.arange(c, dtype=jnp.int32) // voter_num
    pool_mat = (col[:, None] == jnp.arange(num_classes, dtype=jnp.int32)[None, :]
                ).astype(x.dtype)

    tn = _choose_tile_rows(n, c, jnp.dtype(x.dtype).itemsize)
    grid = (pl.cdiv(n, tn),)

    out_shape = jax.ShapeDtypeStruct((n, num_classes), x.dtype)

    return pl.pallas_call(
        _voting_kernel(1.0 / voter_num),
        out_shape=out_shape,
        grid_spec=pltpu.PrefetchScalarGridSpec(
            num_scalar_prefetch=0,
            grid=grid,
            in_specs=[
                # Batch-tiled input stream (double-buffered by Pallas).
                pl.BlockSpec((tn, c), lambda i: (i, 0)),
                # Small pooling matrix, same block for every grid point.
                pl.BlockSpec((c, num_classes), lambda i: (0, 0)),
            ],
            out_specs=pl.BlockSpec((tn, num_classes), lambda i: (i, 0)),
        ),
        compiler_params=pltpu.CompilerParams(
            # Row tiles are independent -> megacore sharding on v7x,
            # harmless no-op on single-TC v5e/v6e.
            dimension_semantics=("parallel",)
        ),
    )(x, pool_mat)


if __name__ == "__main__":
    # VotingLayer has no learnable parameters (AvgPool1d only).
    batch = 16
    num_classes = 10
    voter_num = 8
    c = num_classes * voter_num

    key = jax.random.PRNGKey(0)
    x = jax.random.normal(key, (batch, c), dtype=jnp.float32)

    out = voting_layer(x, voter_num)
    out = jax.block_until_ready(out)

    # Reference check (plain JAX, same math as PyTorch AvgPool1d(k, k)).
    ref = jnp.mean(x.reshape(batch, num_classes, voter_num), axis=-1)
    assert out.shape == (batch, num_classes)
    assert jnp.allclose(out, ref, atol=1e-5, rtol=1e-5)

    print("KERNEL_OK")
</pallas_src>

<mosaic_0001>
module attributes {stable_mosaic.version = 11 : i64} {
  func.func @kernel(%arg0: i32, %arg1: memref<16x80xf32, #tpu.memory_space<vmem>>, %arg2: memref<80x10xf32, #tpu.memory_space<vmem>>, %arg3: memref<16x10xf32, #tpu.memory_space<vmem>>) attributes {dimension_semantics = [#tpu.dimension_semantics<parallel>], iteration_bounds = array<i64: 1>, scalar_prefetch = 0 : i64, scratch_operands = 0 : i64, tpu.core_type = #tpu.core_type<tc>, window_params = [{transform_indices = @transform_0, window_bounds = array<i64: 16, 80>}, {pipeline_mode = #tpu.pipeline_mode<synchronous>, transform_indices = @transform_1, window_bounds = array<i64: 80, 10>}, {transform_indices = @transform_2, window_bounds = array<i64: 16, 10>}]} {
    %c0 = arith.constant 0 : index
    %c0_0 = arith.constant 0 : index
    %0 = vector.load %arg1[%c0, %c0_0] : memref<16x80xf32, #tpu.memory_space<vmem>>, vector<16x80xf32>
    %c0_1 = arith.constant 0 : index
    %c0_2 = arith.constant 0 : index
    %1 = vector.load %arg2[%c0_1, %c0_2] : memref<80x10xf32, #tpu.memory_space<vmem>>, vector<80x10xf32>
    %cst = arith.constant dense<0.000000e+00> : vector<16x10xf32>
    %2 = tpu.matmul %0, %1, %cst {dimension_numbers = #tpu.dot_dimension_numbers<[1], [0], [0], [1], [0, 0, 1, 1], [], []>} : vector<16x80xf32>, vector<80x10xf32>, vector<16x10xf32> -> vector<16x10xf32>
    %cst_3 = arith.constant 1.250000e-01 : f32
    %3 = vector.broadcast %cst_3 : f32 to vector<16x10xf32>
    %4 = arith.mulf %2, %3 : vector<16x10xf32>
    %c0_4 = arith.constant 0 : index
    %c0_5 = arith.constant 0 : index
    %5 = vector.load %arg3[%c0_4, %c0_5] : memref<16x10xf32, #tpu.memory_space<vmem>>, vector<16x10xf32>
    tpu.vector_store %arg3[%c0_4, %c0_5], %4 {strides = array<i32>} : memref<16x10xf32, #tpu.memory_space<vmem>>, vector<16x10xf32>,
    return
  }
  func.func @transform_0(%arg0: i32) -> (i32, i32) {
    %c0_i32 = arith.constant 0 : i32
    %c0_i32_0 = arith.constant 0 : i32
    return %arg0, %c0_i32 : i32, i32
  }
  func.func @transform_1(%arg0: i32) -> (i32, i32) {
    %c0_i32 = arith.constant 0 : i32
    %c0_i32_0 = arith.constant 0 : i32
    %c0_i32_1 = arith.constant 0 : i32
    return %c0_i32, %c0_i32_0 : i32, i32
  }
  func.func @transform_2(%arg0: i32) -> (i32, i32) {
    %c0_i32 = arith.constant 0 : i32
    %c0_i32_0 = arith.constant 0 : i32
    return %arg0, %c0_i32 : i32, i32
  }
}

</mosaic_0001>

<bundles_post_ra>
// kernel: tpu_custom_call.1
= control target key start
LH: loop header
LB: loop body
LE: loop exit
PB: predicated region body
PF: predicated region fallthrough
CT: control target
= control target key end

     0   :  { %vm24_vm0 = vcmask 654336   ;;  %s279_s0 = inlined_call_operand.vmem [shape: f32[16,80], index: 0, kind: input, shape index: {}]   ;;  %s280_s1 = inlined_call_operand.vmem [shape: f32[80,10], index: 1, kind: input, shape index: {}]   ;;  %s281_s2 = inlined_call_operand.hbm [shape: f32[16,10], index: 2, kind: output, shape index: {}]  }
   0x1   :  { %v14_v0 = vld [vmem:[%s280_s1] sm:$0xff]  ;;  %v15_v1 = vld [vmem:[%s280_s1 + $0x8] sm:$0xff]  ;;  %v16_v2 = vld [vmem:[%s280_s1 + $0x10] sm:$0xff] }
   0x2   :  { %v164_v3 = vpack.c.bf16 %v15_v1, %v14_v0  ;;  %v17_v4 = vld [vmem:[%s280_s1 + $0x18] sm:$0xff]  ;;  %v18_v6 = vld [vmem:[%s280_s1 + $0x20] sm:$0xff]  ;;  %v19_v7 = vld [vmem:[%s280_s1 + $0x28] sm:$0xff] }
   0x3   :  { %v168_v5 = vpack.c.bf16 %v17_v4, %v16_v2  ;;  %v12_v8 = vld [vmem:[%s279_s0] sm:$0xff] }
   0x4   :  { %165 = vmatprep.subr.bf16.mxu0 %v164_v3  ;;  %161 = vmatprep.mubr.msk.f32.mxu0 %vm24_vm0, %v12_v8 }
   0x5   :  { %167 = vmatpush3.bf16.msra.mxu0 %v164_v3 }
   0x6   :  { %7 = vsyncpa [#allocation3], 0  ;;  %169 = vmatprep.subr.bf16.mxu0 %v168_v5  ;;  %v172_v9 = vpack.c.bf16 %v19_v7, %v18_v6  ;;  %v20_v10 = vld [vmem:[%s280_s1 + $0x30] sm:$0xff]  ;;  %v21_v11 = vld [vmem:[%s280_s1 + $0x38] sm:$0xff]  ;;  %s211_s5 = smov [#allocation2]   ;;  %vm108_vm1 = vcmask 80896  }
   0x7   :  { %v176_v12 = vpack.c.bf16 %v21_v11, %v20_v10  ;;  %v22_v13 = vld [vmem:[%s280_s1 + $0x40] sm:$0xff]  ;;  %v23_v14 = vld [vmem:[%s280_s1 + $0x48] sm:$0xff]  ;;  %s116_s6 = sshll.u32 %s211_s5, 4  ;;  %s117_s6 = int_to_ptr.vmem [resolvable:$true] %s116_s6 }
   0x8   :  { %v180_v15 = vpack.c.bf16 %v23_v14, %v22_v13  ;;  %v13_v16 = vld [vmem:[%s279_s0 + $0x8] sm:$0xff]  ;;  %s187_s1 = scalar_lea.vmem %s117_s6, 256  ;;  %p192_p1 = scmp.lt.s32.totalorder %s117_s6, %s117_s6 }
   0x9   :  { %171 = vmatpush3.bf16.msra.mxu0 %v168_v5  ;;  %p188_p0 = scmp.ne.s32.totalorder %s117_s6, %s187_s1  ;;  %p193_p2 = scmp.lt.s32.totalorder %s187_s1, %s187_s1 }
   0xa   :  { %173 = vmatprep.subr.bf16.mxu0 %v172_v9 }
   0xb   :  { %p194_p3 = por %p193_p2, %p192_p1 }
   0xd   :  { %175 = vmatpush3.bf16.msra.mxu0 %v172_v9  ;;  %p195_p4 = pnand %p194_p3, %p188_p0 }
   0xe   :  { %177 = vmatprep.subr.bf16.mxu0 %v176_v12 }
  0x11   :  { %179 = vmatpush3.bf16.msra.mxu0 %v176_v12 }
  0x12   :  { %181 = vmatprep.subr.bf16.mxu0 %v180_v15 }
  0x15   :  { %183 = vmatpush3.bf16.msra.mxu0 %v180_v15 }
  0x18   :  { %162 = vmatmul.mubr.msk.f32.vlgmr.msra.gmra.mrb[0].mxu0 %vm24_vm0, %v13_v16 }
  0xeb   :  { %v163_v17 = vpop.f32.mrb[0].mxu0 }
  0xec   :  { %v107_v18 = vmul.f32 0.125, %v163_v17  ;;  %v97_v19 = vpop.f32.mrb[1].mxu0 }
  0xed   :  { %v106_v20 = vmul.f32 0.125, %v97_v19 }
  0xee   :  { %110 = vst.msk [vmem:[#allocation2 + $0x8] sm:$0xff] %vm108_vm1, %v107_v18 }
  0xef   :  { %109 = vst.msk [vmem:[#allocation2] sm:$0xff] %vm108_vm1, %v106_v20 }
  0xf0   :  { %198 = shalt.err (!%p195_p4)
}
  0xf1   :  { %s199_s8 = scalar_lea.hbm %s281_s2, 256 }
  0xf2   :  { %p200_p5 = scmp.ne.s32.totalorder %s281_s2, %s199_s8  ;;  %p203_p6 = scmp.lt.u32.totalorder %s199_s8, %s281_s2 }
  0xf4   :  { %p205_p7 = pnand %p203_p6, %p200_p5 }
  0xf6   :  { %208 = shalt.err (!%p205_p7)
}
  0xf7   :  { %s212_s13 = smov 128   ;;  %s213_s14 = smov 8  }
  0xf8   :  { %122 = dma.vmem_to_hbm [thread:$0]  %s117_s6, 256, %s281_s2, [#allocation3], %s212_s13, %s212_s13, %s213_s14  }
  0xf9   :  { %209 = dma.done.wait [#allocation3], 256  }
  0xfa   :  { %210 = vsyncadd [#allocation3], 4294967040 }
  0xfb   :  { %126 = vsyncpa [#allocation3], 1 }

</bundles_post_ra>
